<compile_context>
chip_gen: v6e
topology: v6e:2x2x1
jax: 0.10.0
libtpu: 0.0.40
codegen_flags: <defaults>
</compile_context>

<pallas_src>
import functools

import jax
import jax.numpy as jnp
from jax.experimental import pallas as pl
from jax.experimental.pallas import tpu as pltpu


_MAX_TILE_ROWS = 8192     # per-block row cap (blocks stay a few MiB for tiny hidden)
_MIN_GRID_BLOCKS = 4      # keep >= this many grid blocks so megacore can shard


def _sublane_packing(dtype) -> int:
    # Rows per packed 32-bit sublane tile: 8 (f32), 16 (bf16/f16), 32 (int8/fp8).
    return max(8, 32 // jnp.dtype(dtype).itemsize)


def _vmem_budget_bytes():
    """Returns (per-tile working-set budget, scoped vmem limit), generation-aware."""
    try:
        cap = int(pltpu.get_tpu_info().vmem_capacity_bytes)
    except Exception:
        cap = 64 * 1024 * 1024   # assume the smallest (v7x-like) VMEM if unknown
    if cap >= 96 * 1024 * 1024:
        # v5e / v6e: 128 MiB physical VMEM -> use bigger tiles, raise the
        # scoped limit well above v5e's 16 MiB default.
        return 48 * 1024 * 1024, 96 * 1024 * 1024
    # v7x: 64 MiB physical per TensorCore; leave headroom for compiler scratch.
    return 20 * 1024 * 1024, 44 * 1024 * 1024


def _pick_tile_rows(rows: int, hidden: int, dtype, budget_bytes: int) -> int:
    """Largest dtype-aligned row tile that fits the budget, with enough blocks
    left over for megacore sharding."""
    packing = _sublane_packing(dtype)
    itemsize = jnp.dtype(dtype).itemsize
    # Double-buffered input + double-buffered output blocks, plus ~2 f32
    # working copies materialized inside the body.
    per_row = hidden * (2 * itemsize + 2 * itemsize + 2 * 4)
    tile = budget_bytes // max(per_row, 1)
    # Keep >= _MIN_GRID_BLOCKS blocks so the "parallel" grid axis can shard
    # across v7x's two TensorCores and the input/output pipeline stays full.
    rows_per_block_target = -(-rows // _MIN_GRID_BLOCKS)            # cdiv(rows, 4)
    shard_cap = -(-rows_per_block_target // packing) * packing      # round up
    tile = min(tile, _MAX_TILE_ROWS, shard_cap)
    tile = max(packing, (tile // packing) * packing)
    return int(tile)


def _rmsnorm_kernel(x_ref, scale_ref, o_ref, *, eps, approx_recip):
    # x_ref:     (tile_rows, hidden)
    # scale_ref: (1, hidden)   -- constant index_map, stays resident in VMEM
    # o_ref:     (tile_rows, hidden)
    x = x_ref[...].astype(jnp.float32)
    d = x.shape[-1]
    sumsq = jnp.sum(x * x, axis=-1, keepdims=True)
    norm = jnp.sqrt(sumsq) * (d ** -0.5)
    # Narrow (tile_rows, 1) reciprocal instead of a full-width divide; exact
    # by default to keep torch-level accuracy (it is off the critical path of
    # an HBM-bound kernel either way).
    inv = pl.reciprocal(norm + eps, approx=approx_recip)
    scale = scale_ref[...].astype(jnp.float32)
    o_ref[...] = (scale * x * inv).astype(o_ref.dtype)


def rmsnorm(x, scale, eps=1e-8, *, tile_rows=None, approx_recip=False):
    """RMSNorm over the last dim of x. scale has shape (x.shape[-1],)."""
    orig_shape = x.shape
    hidden = orig_shape[-1]
    rows = 1
    for s in orig_shape[:-1]:
        rows *= s

    x2 = x.reshape(rows, hidden)
    scale2 = scale.reshape(1, hidden)

    budget, vmem_limit = _vmem_budget_bytes()
    packing = _sublane_packing(x.dtype)
    if tile_rows is None:
        tile_rows = _pick_tile_rows(rows, hidden, x.dtype, budget)
    else:
        tile_rows = max(packing, (int(tile_rows) // packing) * packing)

    grid = (pl.cdiv(rows, tile_rows),)

    out2 = pl.pallas_call(
        functools.partial(_rmsnorm_kernel, eps=eps, approx_recip=approx_recip),
        out_shape=jax.ShapeDtypeStruct((rows, hidden), x.dtype),
        grid_spec=pltpu.PrefetchScalarGridSpec(
            num_scalar_prefetch=0,
            grid=grid,
            in_specs=[
                # Last block dim == full hidden extent: legal even when not a
                # multiple of 128 (masked loads/stores), no wrapper pad/slice.
                pl.BlockSpec((tile_rows, hidden), lambda i: (i, 0)),
                pl.BlockSpec((1, hidden), lambda i: (0, 0)),
            ],
            out_specs=pl.BlockSpec((tile_rows, hidden), lambda i: (i, 0)),
        ),
        compiler_params=pltpu.CompilerParams(
            dimension_semantics=("parallel",),
            vmem_limit_bytes=vmem_limit,
        ),
    )(x2, scale2)

    return out2.reshape(orig_shape)


def rmsnorm_reference(x, scale, eps=1e-8):
    xf = x.astype(jnp.float32)
    norm = jnp.sqrt(jnp.sum(xf * xf, axis=-1, keepdims=True)) * (
        x.shape[-1] ** (-0.5)
    )
    return (scale.astype(jnp.float32) * xf / (norm + eps)).astype(x.dtype)


if __name__ == "__main__":
    key = jax.random.PRNGKey(0)
    k1, k2, k3 = jax.random.split(key, 3)

    # Case 1: shapes implied by the module's usage; hidden=32 exercises the
    # non-128-multiple lane path (masked stores, no wrapper pad/slice).
    # scale = torch.ones(dims) equivalent.
    batch, seq, hidden = 2, 8, 32
    x = jax.random.normal(k1, (batch, seq, hidden), dtype=jnp.float32)
    scale = jnp.ones((hidden,), dtype=jnp.float32)

    out = jax.block_until_ready(rmsnorm(x, scale, eps=1e-8))
    ref = rmsnorm_reference(x, scale, eps=1e-8)
    assert out.shape == x.shape
    assert jnp.allclose(out, ref, atol=1e-5, rtol=1e-5), "mismatch vs reference (case 1)"

    # Case 2: ragged row count (15 rows) with a lane-dense hidden dim (256)
    # and a non-trivial scale, exercising the cdiv / masked-last-block path.
    x_b = jax.random.normal(k2, (3, 5, 256), dtype=jnp.float32)
    scale_b = jax.random.normal(k3, (256,), dtype=jnp.float32)
    out_b = jax.block_until_ready(rmsnorm(x_b, scale_b, eps=1e-8))
    ref_b = rmsnorm_reference(x_b, scale_b, eps=1e-8)
    assert out_b.shape == x_b.shape
    assert jnp.allclose(out_b, ref_b, atol=1e-5, rtol=1e-5), "mismatch vs reference (case 2)"

    print("KERNEL_OK")
</pallas_src>

<mosaic_0001>
module attributes {stable_mosaic.version = 11 : i64} {
  func.func @_rmsnorm_kernel(%arg0: i32, %arg1: memref<8x32xf32, #tpu.memory_space<vmem>>, %arg2: memref<1x32xf32, #tpu.memory_space<vmem>>, %arg3: memref<8x32xf32, #tpu.memory_space<vmem>>) attributes {dimension_semantics = [#tpu.dimension_semantics<parallel>], iteration_bounds = array<i64: 2>, scalar_prefetch = 0 : i64, scratch_operands = 0 : i64, tpu.core_type = #tpu.core_type<tc>, window_params = [{transform_indices = @transform_0, window_bounds = array<i64: 8, 32>}, {pipeline_mode = #tpu.pipeline_mode<synchronous>, transform_indices = @transform_1, window_bounds = array<i64: 1, 32>}, {transform_indices = @transform_2, window_bounds = array<i64: 8, 32>}]} {
    %c0 = arith.constant 0 : index
    %c0_0 = arith.constant 0 : index
    %0 = vector.load %arg1[%c0, %c0_0] : memref<8x32xf32, #tpu.memory_space<vmem>>, vector<8x32xf32>
    %1 = arith.mulf %0, %0 : vector<8x32xf32>
    %cst = arith.constant dense<0.000000e+00> : vector<8xf32>
    %2 = vector.multi_reduction <add>, %1, %cst [1] : vector<8x32xf32> to vector<8xf32>
    %3 = vector.shape_cast %2 : vector<8xf32> to vector<8x1xf32>
    %4 = math.sqrt %3 : vector<8x1xf32>
    %cst_1 = arith.constant 0.176776692 : f32
    %5 = vector.broadcast %cst_1 : f32 to vector<8x1xf32>
    %6 = arith.mulf %4, %5 : vector<8x1xf32>
    %cst_2 = arith.constant 9.99999993E-9 : f32
    %7 = vector.broadcast %cst_2 : f32 to vector<8x1xf32>
    %8 = arith.addf %6, %7 : vector<8x1xf32>
    %9 = tpu.reciprocal %8 : vector<8x1xf32> -> vector<8x1xf32>
    %c0_3 = arith.constant 0 : index
    %c0_4 = arith.constant 0 : index
    %10 = vector.load %arg2[%c0_3, %c0_4] : memref<1x32xf32, #tpu.memory_space<vmem>>, vector<1x32xf32>
    %11 = vector.broadcast %10 : vector<1x32xf32> to vector<8x32xf32>
    %12 = arith.mulf %11, %0 : vector<8x32xf32>
    %13 = vector.broadcast %9 : vector<8x1xf32> to vector<8x32xf32>
    %14 = arith.mulf %12, %13 : vector<8x32xf32>
    %c0_5 = arith.constant 0 : index
    %c0_6 = arith.constant 0 : index
    %15 = vector.load %arg3[%c0_5, %c0_6] : memref<8x32xf32, #tpu.memory_space<vmem>>, vector<8x32xf32>
    tpu.vector_store %arg3[%c0_5, %c0_6], %14 {strides = array<i32>} : memref<8x32xf32, #tpu.memory_space<vmem>>, vector<8x32xf32>,
    return
  }
  func.func @transform_0(%arg0: i32) -> (i32, i32) {
    %c0_i32 = arith.constant 0 : i32
    %c0_i32_0 = arith.constant 0 : i32
    return %arg0, %c0_i32 : i32, i32
  }
  func.func @transform_1(%arg0: i32) -> (i32, i32) {
    %c0_i32 = arith.constant 0 : i32
    %c0_i32_0 = arith.constant 0 : i32
    %c0_i32_1 = arith.constant 0 : i32
    return %c0_i32, %c0_i32_0 : i32, i32
  }
  func.func @transform_2(%arg0: i32) -> (i32, i32) {
    %c0_i32 = arith.constant 0 : i32
    %c0_i32_0 = arith.constant 0 : i32
    return %arg0, %c0_i32 : i32, i32
  }
}

</mosaic_0001>

<bundles_post_ra>
// kernel: tpu_custom_call.1
= control target key start
LH: loop header
LB: loop body
LE: loop exit
PB: predicated region body
PF: predicated region fallthrough
CT: control target
= control target key end

     0   :  { %7 = vsyncpa [#allocation3], 0  ;;  %s589_s0 = inlined_call_operand.hbm [shape: f32[16,32], index: 0, kind: input, shape index: {}]   ;;  %s590_s1 = inlined_call_operand.vmem [shape: f32[1,32], index: 1, kind: input, shape index: {}]   ;;  %s591_s2 = inlined_call_operand.hbm [shape: f32[16,32], index: 2, kind: output, shape index: {}]  }
   0x1   :  { %9 = vsyncpa [#allocation3 + $0x1], 0 }
   0x2   :  { %10 = vsyncpa [#allocation4], 0 }
   0x3   :  { %12 = vsyncpa [#allocation4 + $0x1], 0  ;;  %s443_s9 = smov 0   ;;  %s445_s10 = smov 0  }
   0x4   :  { %s447_s11 = smov 0   ;;  %s449_s12 = smov 0  }
   0x5 LB: > { %s464_s13 = sadd.s32 4294967295, %s424_s12   ;;  %s269_s14 = sadd.s32 4294967294, %s424_s12   ;;  %s424_s12 = sphi %s449_s12, %s608_s12   ;;  %s420_s11 = sphi %s447_s11, %s607_s11   ;;  %s416_s10 = sphi %s445_s10, %s606_s10   ;;  %s412_s9 = sphi %s443_s9, %s605_s9  }
   0x6   : > { %s468_s15 = sadd.s32 1, %s424_s12   ;;  %s25_s16 = sadd.s32 1, %s420_s11 }
   0x7   : > { %s22_s17 = ssub.s32 %s424_s12, %s468_s15  ;;  %p32_p0 = scmp.ne.s32.totalorder %s420_s11, %s416_s10 }
   0x8   : > { %p23_p1 = scmp.eq.s32.totalorder %s22_s17, 0  ;;  %p33_p2 = scmp.eq.s32.totalorder %s424_s12, 0 }
   0x9   : > { %p38_p3 = scmp.ne.s32.totalorder %s416_s10, %s412_s9  ;;  %p39_p4 = scmp.eq.s32.totalorder %s464_s13, 0 }
   0xa   : > { %s480_s18 = scalar_select %p23_p1, %s420_s11, %s25_s16  }
   0xb   : > { %p482_p5 = por %p33_p2, %p32_p0  ;;  %p486_p6 = por %p39_p4, %p38_p3 }
   0xc   : > { %p83_p7 = scmp.eq.s32.totalorder %s464_s13, 1  ;;  %p89_p8 = scmp.eq.s32.totalorder %s269_s14, 1 }
   0xd   : > { %s595_s20 = scalar_select %p486_p6, 1, 0 }
   0xe   : > { %p294_p10 = scmp.lt.s32.totalorder %s424_s12, 2  ;;  %p493_p11 = por %p83_p7, %p32_p0 }
   0xf   : > { %p497_p12 = por %p89_p8, %p38_p3  ;;  %s112_s23 = sand.u32 1, %s420_s11  }
  0x10   : > { %s596_s21 = scalar_select %p493_p11, 1, 0 }
  0x11   : > { %s597_s22 = scalar_select %p497_p12, 1, 0 }
  0x12   : > { %s273_s24 = sshll.u32 %s424_s12, 7  ;;  %s272_s25 = sshll.u32 %s112_s23, 3 }
  0x13   : > { %s506_s28 = scalar_lea.hbm %s589_s0, %s273_s24  ;;  %s116_s29 = scalar_lea.vmem [#allocation2], %s272_s25 }
  0x14   : > { %s123_s30 = sshll.u32 %s116_s29, 4  ;;  %p510_p13 = pnand %p294_p10, %p482_p5  ;;  %s514_s30 = int_to_ptr.vmem [resolvable:$true] %s123_s30 }
  0x15   : > { %s113_s4 = scalar_lea.sflag [#allocation3], %s112_s23  ;;  %s332_s5 = scalar_lea.hbm %s506_s28, 128 }
  0x16   : > { %p333_p2 = scmp.ne.s32.totalorder %s506_s28, %s332_s5  ;;  %p334_p3 = pneg %p510_p13 }
  0x17   : > { %s337_s8 = scalar_lea.hbm %s589_s0, 256  ;;  %p338_p5 = scmp.lt.s32.totalorder %s506_s28, %s589_s0 }
  0x18   : > { %p335_p4 = pnand %p334_p3, %p333_p2  ;;  %p339_p8 = scmp.lt.s32.totalorder %s337_s8, %s332_s5 }
  0x1a   : > { %p336_p7 = pneg %p335_p4  ;;  %p340_p10 = por %p339_p8, %p338_p5 }
  0x1c   : > { %p341_p9 = pnand %p340_p10, %p336_p7 }
  0x1e   : > { %344 = shalt.err (!%p341_p9)
}
  0x1f   : > { %s345_s17 = scalar_lea.vmem %s514_s30, 128  ;;  %s426_s19 = smov [#allocation2]  }
  0x20   : > { %p346_p0 = scmp.ne.s32.totalorder %s514_s30, %s345_s17  ;;  %s350_s23 = sshll.u32 %s426_s19, 4  ;;  %s351_s23 = int_to_ptr.vmem [resolvable:$false] %s350_s23 }
  0x21   : > { %s352_s24 = scalar_lea.vmem %s351_s23, 256  ;;  %p353_p4 = scmp.lt.s32.totalorder %s514_s30, %s351_s23 }
  0x22   : > { %p348_p1 = pnand %p346_p0, %p334_p3  ;;  %p354_p12 = scmp.lt.s32.totalorder %s352_s24, %s345_s17 }
  0x24   : > { %p349_p2 = pneg %p348_p1  ;;  %p355_p11 = por %p354_p12, %p353_p4 }
  0x26   : > { %p356_p6 = pnand %p355_p11, %p349_p2 }
  0x28   : > { %359 = shalt.err (!%p356_p6)
}
  0x29   : > { %289 = dma.hbm_to_vmem [thread:$0]  (!%p510_p13), %s506_s28, 128, %s514_s30, %s113_s4  }
  0x2a   : > { %p599_p9 = scmp.lt.s32.totalorder %s424_s12, 3  ;;  %p600_p7 = scmp.ge.s32.totalorder %s424_s12, 1 }
  0x2c   : > { %p129_p0 = pnand %p600_p7, %p599_p9 }
  0x2d   : > { %s541_s25 = sand.u32 (!%p129_p0), 1, %s416_s10   ;;  %p601_p6 = scmp.ne.s32.totalorder (!%p129_p0), %s595_s20, 0 }
  0x2e   : > { %132 = sbr.rel (%p129_p0) target bundleno = 245 (0xf5), region = 28  ;;  %s275_s26 = sshll.u32 (!%p129_p0), %s541_s25, 3 }
  0x2f   : > { %s135_s27 = scalar_lea.sflag (!%p129_p0), [#allocation3], %s541_s25  ;;  %s138_s29 = scalar_lea.vmem (!%p129_p0), [#allocation2], %s275_s26 }
  0x33   : > { %403 = dma.done.wait (%p601_p6), %s135_s27, 128  }
  0x34   : > { %405 = vsyncadd (%p601_p6), %s135_s27, 4294967168  ;;  %v159_v0 = vld [vmem:[%s138_s29] sm:$0xff]  ;;  %vm161_vm0 = vcmask 261120   ;;  %s279_s30 = sshll.u32 %s464_s13, 7  ;;  %s158_s3 = scalar_lea.vmem [#allocation5], %s275_s26 }
  0x35   : > { %v160_v1 = vmul.f32 %v159_v0, %v159_v0  ;;  %v277_v11 = vld [vmem:[%s590_s1] ss:$0 sm:$0xff]  ;;  %s199_s4 = sshll.u32 %s158_s3, 4  ;;  %s197_s7 = scalar_lea.hbm %s591_s2, %s279_s30  ;;  %s200_s4 = int_to_ptr.vmem [resolvable:$true] %s199_s4 }
  0x36   : > { %v182_v12 = vmul.f32 %v277_v11, %v159_v0  ;;  %s186_s8 = scalar_lea.sflag [#allocation4], %s541_s25  ;;  %s360_s14 = scalar_lea.vmem %s200_s4, 128 }
  0x37   : > { %v162_v2 = vsel %vm161_vm0, %v160_v1, 0.0  ;;  %p361_p11 = scmp.ne.s32.totalorder %s200_s4, %s360_s14  ;;  %p602_p12 = scmp.ne.s32.totalorder %s596_s21, 0 }
  0x38   : > { %163 = vadd.xlane.f32.xlu0 %v162_v2  ;;  %s427_s16 = smov [#allocation5]  }
  0x39   : > { %p362_p13 = pnand %p361_p11, %p602_p12  ;;  %s364_s17 = sshll.u32 %s427_s16, 4  ;;  %s365_s17 = int_to_ptr.vmem [resolvable:$false] %s364_s17 }
  0x3a   : > { %s366_s13 = scalar_lea.vmem %s365_s17, 256  ;;  %p367_p3 = scmp.lt.s32.totalorder %s200_s4, %s365_s17 }
  0x3b   : > { %p363_p1 = pneg %p362_p13  ;;  %p368_p5 = scmp.lt.s32.totalorder %s366_s13, %s360_s14 }
  0x3d   : > { %p369_p8 = por %p368_p5, %p367_p3 }
  0x3f   : > { %p370_p10 = pnand %p369_p8, %p363_p1 }
  0xc1   : > { %v164_v3 = vpop.xlane.xlu0 %163 }
  0xc2   : > { %328 = vrsqrt.f32 %v164_v3  ;;  %vm167_vm1 = vcmp.eq.f32.partialorder %v164_v3, inf  ;;  %v170_v6 = vand.u32 2147483648, %v164_v3  ;;  %vm169_vm2 = vcmp.eq.f32.partialorder %v164_v3, 0.0 }
  0xcf   : > { %v329_v4 = vpop.eup %328 }
  0xd0   : > { %v166_v5 = vmul.f32 %v329_v4, %v164_v3 }
  0xd2   : > { %v168_v7 = vsel %vm167_vm1, %v164_v3, %v166_v5 }
  0xd3   : > { %v171_v8 = vsel %vm169_vm2, %v170_v6, %v168_v7 }
  0xd4   : > { %v172_v9 = vmul.f32 0.17677669, %v171_v8 }
  0xd6   : > { %v173_v10 = vadd.f32 1e-08, %v172_v9 }
  0xd8   : > { %330 = vrcp.f32 %v173_v10 }
  0xe5   : > { %v331_v13 = vpop.eup %330 }
  0xe6   : > { %v183_v14 = vmul.f32 %v331_v13, %v182_v12 }
  0xe8   : > { %184 = vst.msk [vmem:[%s158_s3] sm:$0xff] %vm161_vm0, %v183_v14 }
  0xe9   : > { %373 = shalt.err (!%p370_p10)
}
  0xea   : > { %s374_s19 = scalar_lea.hbm %s197_s7, 128  ;;  %s378_s25 = scalar_lea.hbm %s591_s2, 256 }
  0xeb   : > { %p375_p2 = scmp.ne.s32.totalorder %s197_s7, %s374_s19  ;;  %p379_p7 = scmp.lt.s32.totalorder %s197_s7, %s591_s2 }
  0xec   : > { %p380_p0 = scmp.lt.s32.totalorder %s378_s25, %s374_s19 }
  0xed   : > { %p376_p4 = pnand %p375_p2, %p602_p12 }
  0xee   : > { %p381_p6 = por %p380_p0, %p379_p7 }
  0xef   : > { %p377_p9 = pneg %p376_p4 }
  0xf1   : > { %p382_p11 = pnand %p381_p6, %p377_p9 }
  0xf3   : > { %385 = shalt.err (!%p382_p11)
}
  0xf4   : > { %284 = dma.vmem_to_hbm [thread:$0]  (%p602_p12), %s200_s4, 128, %s197_s7, %s186_s8  }
  0xf5 PF: > { %s211_s29 = sand.u32 1, %s412_s9   ;;  %p603_p13 = scmp.ne.s32.totalorder %s597_s22, 0 }
  0xf6   : > { %p604_p1 = scmp.ge.s32.totalorder %s424_s12, 2  ;;  %s212_s20 = scalar_lea.sflag [#allocation4], %s211_s29 }
  0xf8   : > { %p291_p3 = pnand %p604_p1, %p603_p13 }
  0xfa   : > { %p292_p5 = pneg %p291_p3 }
  0xfc   : > { %407 = dma.done.wait (%p292_p5), %s212_s20, 128  }
  0xfd   : > { %409 = vsyncadd (%p292_p5), %s212_s20, 4294967168  ;;  %p15_p8 = scmp.ge.s32.totalorder %s468_s15, 4   ;;  %s605_s9 = smov %s416_s10 }
  0xfe   : > { %s606_s10 = smov %s420_s11  ;;  %s607_s11 = smov %s480_s18 }
  0xff   : > { %s608_s12 = smov %s468_s15  ;;  %17 = sbr.rel (!%p15_p8) target bundleno = 5 (0x5), region = 73 }
 0x104   :  { %217 = vsyncpa [#allocation3], 1 }
 0x105   :  { %219 = vsyncpa [#allocation3 + $0x1], 1 }
 0x106   :  { %220 = vsyncpa [#allocation4], 1 }
 0x107   :  { %222 = vsyncpa [#allocation4 + $0x1], 1 }

</bundles_post_ra>
